<compile_context>
chip_gen: v7x
topology: tpu7x:2x2x1
jax: 0.10.0
libtpu: 0.0.40
codegen_flags: <defaults>
</compile_context>

<pallas_src>
import math

import jax
import jax.numpy as jnp
from jax.experimental import pallas as pl
from jax.experimental.pallas import tpu as pltpu

_HALF_PI = math.pi / 2.0


def _pe_kernel(x_ref, pos_ref, pe_ref, o_ref):
    # One grid step == one (seq-tile, batch-element) pair.
    pos = pos_ref[0]                      # (TS, 1) precomputed normalized positions
    arg = pe_ref[...] * pos               # (TS, D), broadcast over lanes

    # cos(t) == sin(t + pi/2): odd columns get a +pi/2 offset so a single sin (one
    # EUP transcendental per element) covers both halves of the interleaved encoding.
    # NOTE: if D is ever tiled across the grid, `col` must become the GLOBAL column
    # index (tile offset + local iota) so the even/odd parity stays correct.
    col = jax.lax.broadcasted_iota(jnp.int32, arg.shape, 1)
    offset = (col % 2).astype(jnp.float32) * _HALF_PI
    o_ref[0] = x_ref[0] + jnp.sin(arg + offset)
    # TODO(synk): training-mode dropout (p=0.1) not implemented; eval-mode identity.


def _choose_seq_tile(S, D, dtype_bytes=4, budget_bytes=6 * 1024 * 1024):
    """Largest seq tile such that the double-buffered x/out/pe/pos tiles fit the budget."""
    # per seq row: x + out + pe (lane-dense, double buffered) + lane-padded pos row.
    per_row = 2 * (3 * D + 128) * dtype_bytes
    ts = max(8, budget_bytes // per_row)
    if ts >= S:
        return S
    return max(8, (ts // 8) * 8)          # keep the sublane dim a multiple of 8


def positional_encoding(x, indexes, pe, *, seq_tile=None):
    """x: (B, S, D) f32, indexes: (B, S, 1) f32, pe: (S, D) f32 -> (B, S, D) f32."""
    B, S, D = x.shape
    assert indexes.shape == (B, S, 1)
    assert pe.shape == (S, D), "PyTorch forward requires seq_len == max_len"

    # Per-batch index normalization is a tiny O(B*S) reduction; doing it here keeps
    # the kernel elementwise (so seq can be tiled) and drops the lane-padded (S,1)
    # block + XLU reductions from the kernel body.
    idx = indexes.astype(jnp.float32)
    mn = jnp.min(idx, axis=1, keepdims=True)            # (B, 1, 1)
    mx = jnp.max(idx, axis=1, keepdims=True)            # (B, 1, 1)
    denom = mx - mn
    # torch.nan_to_num(nan=0.0): the only NaN source is 0/0 (constant index row);
    # divide by a safe denom so the NaN is never generated, then select 0 there.
    pos = jnp.where(denom == 0.0, 0.0,
                    (idx - mn) / jnp.where(denom == 0.0, 1.0, denom))
    pos = pos.astype(x.dtype)                           # (B, S, 1)

    TS = seq_tile if seq_tile is not None else _choose_seq_tile(S, D)
    n_s = pl.cdiv(S, TS)

    cost = pl.CostEstimate(
        flops=2 * B * S * D,                            # mul + add per element
        transcendentals=B * S * D,                      # one sin per element
        bytes_accessed=(2 * B * S * D + S * D + B * S) * jnp.dtype(x.dtype).itemsize,
    )

    # Grid ordered (seq_tile, batch): batch is the fastest-varying axis, so the pe
    # block index is constant across the inner batch loop and pe is not re-fetched.
    return pl.pallas_call(
        _pe_kernel,
        out_shape=jax.ShapeDtypeStruct((B, S, D), x.dtype),
        grid=(n_s, B),
        in_specs=[
            pl.BlockSpec((1, TS, D), lambda s, b: (b, s, 0)),   # x
            pl.BlockSpec((1, TS, 1), lambda s, b: (b, s, 0)),   # pos
            pl.BlockSpec((TS, D), lambda s, b: (s, 0)),         # pe (resident over batch)
        ],
        out_specs=pl.BlockSpec((1, TS, D), lambda s, b: (b, s, 0)),
        compiler_params=pltpu.CompilerParams(
            dimension_semantics=("parallel", "parallel"),
            vmem_limit_bytes=32 * 1024 * 1024,
        ),
        cost_estimate=cost,
    )(x, pos, pe)


def make_pe_param(d_model: int, max_len: int) -> jnp.ndarray:
    """Deterministic init matching the module: pe[l, 2i] = pe[l, 2i+1] = div_term[i]."""
    div_term = jnp.exp(
        jnp.arange(0, d_model, 2, dtype=jnp.float32) * (-math.log(10000.0) / d_model)
    )                                                   # (d_model // 2,)
    pe_row = jnp.repeat(div_term, 2)                    # (d_model,)
    return jnp.tile(pe_row[None, :], (max_len, 1))      # (max_len, d_model)


def reference(x, indexes, pe):
    """Pure-JAX reference of the PyTorch forward (eval mode)."""
    mn = jnp.min(indexes, axis=1, keepdims=True)
    mx = jnp.max(indexes, axis=1, keepdims=True)
    pos = jnp.nan_to_num((indexes - mn) / (mx - mn), nan=0.0)     # (B, S, 1)
    arg = pe[None, :, :] * pos                                    # (B, S, D)
    col = jnp.arange(pe.shape[1]) % 2
    enc = jnp.where(col[None, None, :] == 0, jnp.sin(arg), jnp.cos(arg))
    return x + enc


if __name__ == "__main__":
    key = jax.random.PRNGKey(0)

    # --- small demo shape (seq == max_len), includes a degenerate constant-index row ---
    B, S, D = 2, 8, 32
    kx, ki = jax.random.split(key)
    x = jax.random.normal(kx, (B, S, D), dtype=jnp.float32)
    indexes = jax.random.uniform(ki, (B, S, 1), dtype=jnp.float32, minval=0.0, maxval=100.0)
    indexes = indexes.at[1].set(7.5)      # constant row -> exercises the 0/0 -> 0 path
    pe = make_pe_param(D, S)

    out = jax.block_until_ready(positional_encoding(x, indexes, pe))
    ref = reference(x, indexes, pe)
    assert out.shape == (B, S, D) and out.dtype == jnp.float32
    assert jnp.allclose(out, ref, atol=1e-5, rtol=1e-5), "mismatch vs reference (S=8)"

    # --- second check with a forced smaller seq tile to exercise (seq_tile, batch) tiling ---
    B2, S2, D2 = 2, 16, 32
    kx2, ki2 = jax.random.split(jax.random.PRNGKey(1))
    x2 = jax.random.normal(kx2, (B2, S2, D2), dtype=jnp.float32)
    idx2 = jax.random.uniform(ki2, (B2, S2, 1), dtype=jnp.float32, minval=0.0, maxval=50.0)
    pe2 = make_pe_param(D2, S2)

    out2 = jax.block_until_ready(positional_encoding(x2, idx2, pe2, seq_tile=8))
    ref2 = reference(x2, idx2, pe2)
    assert jnp.allclose(out2, ref2, atol=1e-5, rtol=1e-5), "mismatch vs reference (tiled S=16)"

    print("KERNEL_OK")
</pallas_src>

<mosaic_0001>
module attributes {stable_mosaic.version = 11 : i64} {
  func.func @_pe_kernel(%arg0: i32, %arg1: i32, %arg2: memref<1x8x32xf32, #tpu.memory_space<vmem>>, %arg3: memref<1x8x1xf32, #tpu.memory_space<vmem>>, %arg4: memref<8x32xf32, #tpu.memory_space<vmem>>, %arg5: memref<1x8x32xf32, #tpu.memory_space<vmem>>) attributes {dimension_semantics = [#tpu.dimension_semantics<parallel>, #tpu.dimension_semantics<parallel>], iteration_bounds = array<i64: 1, 2>, scalar_prefetch = 0 : i64, scratch_operands = 0 : i64, tpu.core_type = #tpu.core_type<tc>, window_params = [{transform_indices = @transform_0, window_bounds = array<i64: 1, 8, 32>}, {transform_indices = @transform_1, window_bounds = array<i64: 1, 8, 1>}, {transform_indices = @transform_2, window_bounds = array<i64: 8, 32>}, {transform_indices = @transform_3, window_bounds = array<i64: 1, 8, 32>}]} {
    %c0 = arith.constant 0 : index
    %c0_0 = arith.constant 0 : index
    %c0_1 = arith.constant 0 : index
    %0 = vector.load %arg3[%c0, %c0_0, %c0_1] : memref<1x8x1xf32, #tpu.memory_space<vmem>>, vector<1x8x1xf32>
    %1 = vector.shape_cast %0 : vector<1x8x1xf32> to vector<8x1xf32>
    %c0_2 = arith.constant 0 : index
    %c0_3 = arith.constant 0 : index
    %2 = vector.load %arg4[%c0_2, %c0_3] : memref<8x32xf32, #tpu.memory_space<vmem>>, vector<8x32xf32>
    %3 = vector.broadcast %1 : vector<8x1xf32> to vector<8x32xf32>
    %4 = arith.mulf %2, %3 : vector<8x32xf32>
    %5 = tpu.iota {dimensions = array<i32: 1>} : vector<8x32xi32>
    %c2_i32 = arith.constant 2 : i32
    %c0_i32 = arith.constant 0 : i32
    %6 = arith.cmpi eq, %c2_i32, %c0_i32 : i32
    %c1_i32 = arith.constant 1 : i32
    %7 = arith.select %6, %c1_i32, %c2_i32 : i32
    %8 = vector.broadcast %7 : i32 to vector<8x32xi32>
    %9 = arith.remsi %5, %8 : vector<8x32xi32>
    %c0_i32_4 = arith.constant 0 : i32
    %10 = vector.broadcast %c0_i32_4 : i32 to vector<8x32xi32>
    %11 = arith.cmpi ne, %9, %10 : vector<8x32xi32>
    %c0_i32_5 = arith.constant 0 : i32
    %12 = vector.broadcast %c0_i32_5 : i32 to vector<8x32xi32>
    %13 = arith.cmpi slt, %9, %12 : vector<8x32xi32>
    %c0_i32_6 = arith.constant 0 : i32
    %14 = arith.cmpi slt, %7, %c0_i32_6 : i32
    %15 = vector.broadcast %14 : i1 to vector<8x32xi1>
    %16 = vector.broadcast %15 : vector<8x32xi1> to vector<8x32xi1>
    %17 = arith.xori %13, %16 : vector<8x32xi1>
    %18 = arith.andi %17, %11 : vector<8x32xi1>
    %19 = vector.broadcast %7 : i32 to vector<8x32xi32>
    %20 = arith.addi %9, %19 : vector<8x32xi32>
    %21 = arith.select %18, %20, %9 : vector<8x32xi1>, vector<8x32xi32>
    %22 = arith.sitofp %21 : vector<8x32xi32> to vector<8x32xf32>
    %cst = arith.constant 1.57079637 : f32
    %23 = vector.broadcast %cst : f32 to vector<8x32xf32>
    %24 = arith.mulf %22, %23 : vector<8x32xf32>
    %c0_7 = arith.constant 0 : index
    %c0_8 = arith.constant 0 : index
    %c0_9 = arith.constant 0 : index
    %25 = vector.load %arg2[%c0_7, %c0_8, %c0_9] : memref<1x8x32xf32, #tpu.memory_space<vmem>>, vector<1x8x32xf32>
    %26 = vector.shape_cast %25 : vector<1x8x32xf32> to vector<8x32xf32>
    %27 = arith.addf %4, %24 : vector<8x32xf32>
    %28 = math.sin %27 : vector<8x32xf32>
    %29 = arith.addf %26, %28 : vector<8x32xf32>
    %c0_10 = arith.constant 0 : index
    %c0_11 = arith.constant 0 : index
    %c0_12 = arith.constant 0 : index
    %30 = vector.load %arg5[%c0_10, %c0_11, %c0_12] : memref<1x8x32xf32, #tpu.memory_space<vmem>>, vector<1x8x32xf32>
    %31 = vector.shape_cast %30 : vector<1x8x32xf32> to vector<8x32xf32>
    %32 = vector.shape_cast %29 : vector<8x32xf32> to vector<1x8x32xf32>
    tpu.vector_store %arg5[%c0_10, %c0_11, %c0_12], %32 {strides = array<i32>} : memref<1x8x32xf32, #tpu.memory_space<vmem>>, vector<1x8x32xf32>,
    return
  }
  func.func @transform_0(%arg0: i32, %arg1: i32) -> (i32, i32, i32) {
    %c0_i32 = arith.constant 0 : i32
    %c0_i32_0 = arith.constant 0 : i32
    return %arg1, %arg0, %c0_i32 : i32, i32, i32
  }
  func.func @transform_1(%arg0: i32, %arg1: i32) -> (i32, i32, i32) {
    %c0_i32 = arith.constant 0 : i32
    %c0_i32_0 = arith.constant 0 : i32
    return %arg1, %arg0, %c0_i32 : i32, i32, i32
  }
  func.func @transform_2(%arg0: i32, %arg1: i32) -> (i32, i32) {
    %c0_i32 = arith.constant 0 : i32
    %c0_i32_0 = arith.constant 0 : i32
    return %arg0, %c0_i32 : i32, i32
  }
  func.func @transform_3(%arg0: i32, %arg1: i32) -> (i32, i32, i32) {
    %c0_i32 = arith.constant 0 : i32
    %c0_i32_0 = arith.constant 0 : i32
    return %arg1, %arg0, %c0_i32 : i32, i32, i32
  }
}

</mosaic_0001>

<bundles_post_ra>
// kernel: tpu_custom_call.1
= control target key start
LH: loop header
LB: loop body
LE: loop exit
PB: predicated region body
PF: predicated region fallthrough
CT: control target
= control target key end

     0   :  { %8 = vsyncpa [#allocation3], 0  ;;  %s827_s0 = inlined_call_operand.vmem [shape: f32[2,8,32], index: 0, kind: input, shape index: {}]   ;;  %s828_s1 = inlined_call_operand.vmem [shape: f32[2,8,1], index: 1, kind: input, shape index: {}]   ;;  %s829_s2 = inlined_call_operand.vmem [shape: f32[8,32], index: 2, kind: input, shape index: {}]   ;;  %s830_s3 = inlined_call_operand.hbm [shape: f32[2,8,32], index: 3, kind: output, shape index: {}]  }
   0x1   :  { %10 = vsyncpa [#allocation3 + $0x1], 0  ;;  %s681_s12 = smov 0   ;;  %s683_s13 = smov 0  }
   0x2   :  { %s685_s14 = smov 0   ;;  %s687_s15 = smov 0  }
   0x3   :  { %s689_s16 = smov 0   ;;  %s691_s17 = smov 0  }
   0x4 LB: > { %s485_s18 = sadd.s32 4294967295, %s651_s17   ;;  %s486_s19 = sadd.s32 4294967294, %s651_s17   ;;  %s651_s17 = sphi %s691_s17, %s16_s17   ;;  %s647_s16 = sphi %s689_s16, %s837_s16   ;;  %s643_s15 = sphi %s687_s15, %s836_s15   ;;  %s639_s14 = sphi %s685_s14, %s835_s14   ;;  %s635_s13 = sphi %s683_s13, %s834_s13   ;;  %s631_s12 = sphi %s681_s12, %s833_s12  }
   0x5   : > { %s25_s20 = sadd.s32 1, %s647_s16  ;;  %s119_s21 = sadd.s32 1, %s639_s14 }
   0x6   : > { %p26_p0 = scmp.ge.s32.totalorder %s25_s20, 2  ;;  %p129_p1 = scmp.ne.s32.totalorder %s639_s14, %s635_s13 }
   0x7   : > { %p130_p2 = scmp.eq.s32.totalorder %s485_s18, 1  ;;  %p135_p3 = scmp.ne.s32.totalorder %s635_s13, %s631_s12 }
   0x8   : > { %s839_s20 = smov (%p26_p0, %s25_s20), 0  ;;  %p136_p5 = scmp.eq.s32.totalorder %s486_s19, 1 }
   0x9   : > { %p721_p4 = por %p130_p2, %p129_p1  ;;  %s114_s23 = ssub.s32 %s647_s16, %s839_s20 }
   0xa   : > { %p490_p6 = scmp.ge.s32.totalorder %s651_s17, 1  ;;  %p117_p7 = scmp.eq.s32.totalorder %s114_s23, 0 }
   0xb   : > { %p728_p8 = por %p136_p5, %p135_p3  ;;  %p181_p9 = scmp.lt.s32.totalorder %s651_s17, 3 }
   0xc   : > { %s734_s25 = scalar_select %p117_p7, %s639_s14, %s119_s21  }
   0xd   : > { %p182_p10 = pnand %p490_p6, %p181_p9 }
   0xe   : > { %p218_p11 = scmp.lt.s32.totalorder (!%p182_p10), %s643_s15, 1  ;;  %v653_v0 = vmov (!%p182_p10), 0   ;;  %v244_v2 = vlaneseq (!%p182_p10)  ;;  %v237_v6 = vld [vmem:[%s829_s2] sm:$0xff] (!%p182_p10)  ;;  %v654_v21 = vmov (!%p182_p10), 683565275   ;;  %s215_s6 = sand.u32 (!%p182_p10), 1, %s635_s13  }
   0xf   : > { %185 = sbr.rel (%p182_p10) target bundleno = 254 (0xfe), region = 32  ;;  %568 = vset.pattern.permute.xlu0 (!%p182_p10), %v653_v0  ;;  %v655_v23 = vmov (!%p182_p10), 2475754826   ;;  %v656_v26 = vmov (!%p182_p10), 2131351028   ;;  %s491_s7 = sshll.u32 (!%p182_p10), %s215_s6, 3 }
  0x10   : > { %v245_v3 = vand.u32 (!%p182_p10), 127, %v244_v2  ;;  %v657_v29 = vmov (!%p182_p10), 2102212464   ;;  %v658_v32 = vmov (!%p182_p10), 920167782   ;;  %s499_s11 = sshll.u32 (!%p182_p10), %s643_s15, 7 }
  0x11   : > { %v659_v35 = vmov (!%p182_p10), 1326507024   ;;  %s217_s18 = scalar_lea.vmem (!%p182_p10), [#allocation2], %s491_s7  ;;  %vm367_vm13 = vcmask (!%p182_p10), 261120   ;;  %s660_s28 = smov (!%p182_p10), [#allocation2]  }
  0x12   : > { %v250_v4 = vand.u32 (!%p182_p10), 1, %v245_v3  ;;  %s384_s19 = sshll.u32 (!%p182_p10), %s217_s18, 4  ;;  %s577_s29 = sshll.u32 (!%p182_p10), %s660_s28, 4  ;;  %s782_s19 = int_to_ptr.vmem [resolvable:$true] %s384_s19  ;;  %s578_s29 = int_to_ptr.vmem [resolvable:$false] %s577_s29 }
  0x13   : > { %p580_p1 = scmp.lt.s32.totalorder (!%p182_p10), %s782_s19, %s578_s29 }
  0x14   : > { %v258_v5 = vcvt.s32.f32 (!%p182_p10), %v250_v4 }
  0x16   : > { %s738_s26 = scalar_select %p218_p11, %s643_s15, 1  ;;  %v259_v7 = vmul.f32 1.5707964, %v258_v5 }
  0x17   : > { %s370_s15 = scalar_lea.sflag [#allocation3], %s215_s6 }
  0x18   : > { %s492_s27 = sshll.u32 %s738_s26, 3  ;;  %s780_s26 = scalar_lea.hbm %s830_s3, %s499_s11 }
  0x19   : > { %s231_s30 = scalar_lea.vmem %s828_s1, %s492_s27  ;;  %s224_s10 = scalar_lea.vmem %s827_s0, %s492_s27 }
  0x1a   : > { %v236_v1 = vld [vmem:[%s231_s30] sm:$0xff]  ;;  %s573_s27 = scalar_lea.vmem %s782_s19, 128  ;;  %s579_s30 = scalar_lea.vmem %s578_s29, 256 }
  0x1b   : > { %240 = vperm.xlu0 %568, %v236_v1   ;;  %p574_p12 = scmp.ne.s32.totalorder %s782_s19, %s573_s27  ;;  %p581_p2 = scmp.lt.s32.totalorder %s579_s30, %s573_s27 }
  0x1d   : > { %p575_p13 = pnand %p574_p12, %p721_p4  ;;  %p582_p3 = por %p581_p2, %p580_p1 }
  0x1f   : > { %p576_p0 = pneg %p575_p13 }
  0x21   : > { %p583_p5 = pnand %p582_p3, %p576_p0 }
  0x9a   : > { %v241_v8 = vpop.permute.xlu0 %240 }
  0x9b   : > { %v243_v9 = vmul.f32 %v241_v8, %v237_v6 }
  0x9d   : > { %v749_v10 = vadd.f32 %v259_v7, %v243_v9 }
  0x9f   : > { %v265_v11 = vand.u32 2139095040, %v749_v10  ;;  %v262_v15 = vand.u32 2147483647, %v749_v10  ;;  %vm264_vm7 = vcmp.lt.s32.totalorder %v749_v10, 0  ;;  %vm354_vm12 = vweird.f32 %v749_v10 }
  0xa1   : > { %v266_v12 = vshrl.u32 %v265_v11, 23  ;;  %v269_v18 = vand.u32 8388607, %v262_v15  ;;  %vm263_vm8 = vcmp.le.f32.partialorder %v262_v15, 0.7853982 }
  0xa3   : > { %v494_v13 = vadd.s32 4294967169, %v266_v12  ;;  %v270_v37 = vor.u32 8388608, %v269_v18 }
  0xa5   : > { %v272_v14 = vadd.s32 1, %v494_v13  ;;  %v310_v51 = vshll.u32 %v270_v37, 8 }
  0xa7   : > { %vm273_vm0 = vcmp.gt.s32.totalorder %v272_v14, 0 }
  0xa8   : > { %v274_v16 = vsel %vm273_vm0, %v272_v14, 0 }
  0xa9   : > { %v276_v17 = vand.u32 31, %v274_v16  ;;  %v275_v20 = vshrl.u32 %v274_v16, 5 }
  0xab   : > { %v277_v19 = vsub.s32 32, %v276_v17  ;;  %v279_v22 = vshll.u32 %v654_v21, %v276_v17  ;;  %v282_v24 = vshll.u32 %v655_v23, %v276_v17  ;;  %v285_v28 = vshll.u32 %v656_v26, %v276_v17 }
  0xac   : > { %v288_v31 = vshll.u32 %v657_v29, %v276_v17  ;;  %v291_v34 = vshll.u32 %v658_v32, %v276_v17  ;;  %vm294_vm1 = vcmp.lt.s32.totalorder %v275_v20, 1  ;;  %vm297_vm2 = vcmp.lt.s32.totalorder %v275_v20, 4 }
  0xad   : > { %v280_v25 = vshrl.u32 %v655_v23, %v277_v19  ;;  %v283_v27 = vshrl.u32 %v656_v26, %v277_v19  ;;  %v286_v30 = vshrl.u32 %v657_v29, %v277_v19  ;;  %v289_v33 = vshrl.u32 %v658_v32, %v277_v19 }
  0xae   : > { %v292_v36 = vshrl.u32 %v659_v35, %v277_v19  ;;  %v278_v46 = vshrl.u32 %v654_v21, %v277_v19  ;;  %vm296_vm3 = vcmp.lt.s32.totalorder %v275_v20, 3  ;;  %vm295_vm4 = vcmp.lt.s32.totalorder %v275_v20, 2 }
  0xaf   : > { %v281_v38 = vor.u32 %v280_v25, %v279_v22  ;;  %v284_v39 = vor.u32 %v283_v27, %v282_v24  ;;  %v287_v40 = vor.u32 %v286_v30, %v285_v28  ;;  %v290_v41 = vor.u32 %v289_v33, %v288_v31 }
  0xb0   : > { %v293_v42 = vor.u32 %v292_v36, %v291_v34  ;;  %v260_v36 = vld [vmem:[%s224_s10] sm:$0xff] }
  0xb1   : > { %v299_v43 = vsel %vm297_vm2, %v287_v40, 2102212464  ;;  %v302_v44 = vsel %vm294_vm1, %v281_v38, %v284_v39  ;;  %v306_v45 = vsel %vm294_vm1, %v284_v39, %v287_v40  ;;  %v303_v47 = vsel %vm297_vm2, %v290_v41, 920167782 }
  0xb2   : > { %v307_v48 = vsel %vm297_vm2, %v293_v42, 1326507024  ;;  %v304_v49 = vsel %vm296_vm3, %v287_v40, %v303_v47  ;;  %v298_v52 = vsel %vm294_vm1, %v278_v46, %v281_v38  ;;  %v300_v53 = vsel %vm296_vm3, %v284_v39, %v299_v43 }
  0xb3   : > { %v308_v50 = vsel %vm296_vm3, %v290_v41, %v307_v48  ;;  %v305_v54 = vsel %vm295_vm4, %v302_v44, %v304_v49  ;;  %v301_v60 = vsel %vm295_vm4, %v298_v52, %v300_v53 }
  0xb4   : > { %v309_v55 = vsel %vm295_vm4, %v306_v45, %v308_v50  ;;  %v758_v58 = vmul.u32.u64.low %v310_v51, %v305_v54  ;;  %v759_v59 = vmul.u32.u64.high %v310_v51, %v305_v54, %v758_v58  ;;  %v317_v62 = vmul.u32 %v310_v51, %v301_v60 }
  0xb5   : > { %v755_v56 = vmul.u32.u64.low %v310_v51, %v309_v55  ;;  %v756_v57 = vmul.u32.u64.high %v310_v51, %v309_v55, %v755_v56 }
  0xb6   : > { %v320_v61 = vadd.s32 1, %v759_v59 }
  0xb7   : > { %vm319_vm5 = vc.u32 %v756_v57, %v758_v58  ;;  %v318_v11 = vadd.s32 %v758_v58, %v756_v57 }
  0xb8   : > { %v321_v63 = vsel %vm319_vm5, %v320_v61, %v759_v59 }
  0xb9   : > { %v322_v0 = vadd.s32 %v321_v63, %v317_v62 }
  0xbb   : > { %v323_v1 = vadd.s32 536870912, %v322_v0 }
  0xbd   : > { %v324_v2 = vshrl.u32 %v323_v1, 30 }
  0xbf   : > { %v325_v3 = vshll.u32 %v324_v2, 30  ;;  %v348_v24 = vsub.s32 4, %v324_v2 }
  0xc1   : > { %v326_v4 = vsub.s32 %v322_v0, %v325_v3  ;;  %v349_v27 = vsel %vm264_vm7, %v348_v24, %v324_v2 }
  0xc2   : > { %v351_v29 = vsel %vm263_vm8, 0, %v349_v27 }
  0xc3   : > { %v328_v5 = vsub.s32 0, %v326_v4  ;;  %v355_v30 = vadd.s32 3, %v351_v29 }
  0xc5   : > { %v495_v6 = vmin.u32 %v328_v5, %v326_v4  ;;  %v356_v31 = vand.u32 3, %v355_v30 }
  0xc7   : > { %v330_v7 = vclz %v495_v6  ;;  %vm361_vm9 = vcmp.eq.s32.totalorder %v356_v31, 2  ;;  %vm358_vm10 = vcmp.eq.s32.totalorder %v356_v31, 0  ;;  %vm357_vm11 = vcmp.lt.s32.totalorder %v356_v31, 2 }
  0xc9   : > { %v496_v8 = vadd.s32 4294967294, %v330_v7 }
  0xcb   : > { %vm497_vm6 = vcmp.lt.s32.totalorder %v496_v8, 0 }
  0xcc   : > { %v333_v9 = vsel %vm497_vm6, 0, %v496_v8 }
  0xcd   : > { %v334_v12 = vsub.s32 32, %v333_v9  ;;  %v338_v13 = vsub.s32 4294967266, %v333_v9  ;;  %v335_v14 = vshll.u32 %v326_v4, %v333_v9 }
  0xcf   : > { %v336_v16 = vshrl.u32 %v318_v11, %v334_v12  ;;  %v339_v17 = vadd.s32 127, %v338_v13 }
  0xd1   : > { %v337_v18 = vor.u32 %v336_v16, %v335_v14  ;;  %v340_v19 = vshll.u32 %v339_v17, 23 }
  0xd3   : > { %v341_v20 = vor.u32 4788187, %v340_v19  ;;  %v344_v22 = vcvt.s32.f32 %v337_v18 }
  0xd5   : > { %v342_v21 = vand.u32 2147483647, %v341_v20 }
  0xd7   : > { %v345_v23 = vmul.f32 %v344_v22, %v342_v21 }
  0xd9   : > { %v346_v25 = vxor.u32 2147483648, %v345_v23 }
  0xdb   : > { %v347_v26 = vsel %vm264_vm7, %v346_v25, %v345_v23 }
  0xdc   : > { %v350_v28 = vsel %vm263_vm8, %v749_v10, %v347_v26 }
  0xdd   : > { %569 = vcosq.f32 %v350_v28 }
  0xde   : > { %571 = vsinq.f32 %v350_v28 }
  0xe7   : > { %v570_v32 = vpop.eup %569 }
  0xe8   : > { %v572_v33 = vpop.eup %571  ;;  %v362_v15 = vxor.u32 2147483648, %v570_v32 }
  0xe9   : > { %v359_v34 = vxor.u32 2147483648, %v572_v33 }
  0xea   : > { %v363_v35 = vsel %vm361_vm9, %v362_v15, %v572_v33 }
  0xeb   : > { %v360_v37 = vsel %vm358_vm10, %v570_v32, %v359_v34 }
  0xec   : > { %v364_v38 = vsel %vm357_vm11, %v360_v37, %v363_v35 }
  0xed   : > { %v365_v39 = vsel %vm354_vm12, nan, %v364_v38 }
  0xee   : > { %v366_v40 = vadd.f32 %v365_v39, %v260_v36 }
  0xf0   : > { %368 = vst.msk [vmem:[%s217_s18] sm:$0xff] %vm367_vm13, %v366_v40 }
  0xf1   : > { %586 = shalt.err (!%p583_p5)
}
  0xf2   : > { %s587_s4 = scalar_lea.hbm %s780_s26, 128  ;;  %s591_s7 = scalar_lea.hbm %s830_s3, 256 }
  0xf3   : > { %p588_p6 = scmp.ne.s32.totalorder %s780_s26, %s587_s4  ;;  %p592_p10 = scmp.lt.u32.totalorder %s780_s26, %s830_s3 }
  0xf4   : > { %p593_p11 = scmp.lt.u32.totalorder %s591_s7, %s587_s4  ;;  %p595_p13 = scmp.lt.u32.totalorder %s587_s4, %s780_s26 }
  0xf5   : > { %p589_p7 = pnand %p588_p6, %p721_p4 }
  0xf6   : > { %p594_p12 = por %p593_p11, %p592_p10 }
  0xf7   : > { %p590_p9 = pneg %p589_p7 }
  0xf8   : > { %p596_p0 = por %p595_p13, %p594_p12 }
  0xfa   : > { %p597_p1 = pnand %p596_p0, %p590_p9 }
  0xfc   : > { %600 = shalt.err (!%p597_p1)
}
  0xfd   : > { %506 = dma.vmem_to_hbm [thread:$0]  (%p721_p4), %s782_s19, 128, %s780_s26, %s370_s15  }
  0xfe PF: > { %p512_p2 = scmp.ge.s32.totalorder %s651_s17, 2  ;;  %s396_s10 = sand.u32 1, %s631_s12  }
  0xff   : > { %s397_s11 = scalar_lea.sflag [#allocation3], %s396_s10 }
 0x100   : > { %p509_p3 = pnand %p512_p2, %p728_p8 }
 0x102   : > { %626 = dma.done.wait (!%p509_p3), %s397_s11, 128  }
 0x103   : > { %628 = vsyncadd (!%p509_p3), %s397_s11, 4294967168  ;;  %s16_s17 = sadd.s32 1, %s651_s17   ;;  %s833_s12 = smov %s635_s13 }
 0x104   : > { %p13_p5 = scmp.ge.s32.totalorder %s16_s17, 4   ;;  %s834_s13 = smov %s639_s14 }
 0x105   : > { %s835_s14 = smov %s734_s25  ;;  %s836_s15 = smov %s647_s16 }
 0x106   : > { %s837_s16 = smov %s839_s20  ;;  %15 = sbr.rel (!%p13_p5) target bundleno = 4 (0x4), region = 73 }
 0x10d   :  { %402 = vsyncpa [#allocation3], 1 }
 0x10e   :  { %404 = vsyncpa [#allocation3 + $0x1], 1 }

</bundles_post_ra>
